<compile_context>
chip_gen: v5e
topology: v5e:2x2
jax: 0.10.0
libtpu: 0.0.40
codegen_flags: <defaults>
</compile_context>

<pallas_src>
import jax
import jax.numpy as jnp
from jax import lax
from jax.experimental import pallas as pl
from jax.experimental.pallas import tpu as pltpu

NUM_CLASSES = 23

# Per-block spatial-element budget: 23 * 32K * 4 B * 2 (double buffer) ~= 6 MiB.
_MAX_TILE_ELEMS = 32 * 1024
_VMEM_LIMIT_BYTES = 32 * 1024 * 1024  # safe on v5e/v6e (128 MiB) and v7x (64 MiB)


# ----------------------------- kernels ------------------------------------ #

def _one_hot_hw_kernel(y_ref, out_ref):
    """Direct-layout path. y_ref: (tile_h, W) int32; out_ref: (C, tile_h, W) f32."""
    labels = jnp.where(y_ref[...] == -1, 1, y_ref[...])              # (tile_h, W)
    cls = lax.broadcasted_iota(jnp.int32, out_ref.shape, 0)          # (C, tile_h, W)
    out_ref[...] = (cls == labels[None, :, :]).astype(jnp.float32)


def _one_hot_flat_kernel(y_ref, out_ref):
    """Flattened path. y_ref: (1, tile_n) int32; out_ref: (C, tile_n) f32."""
    labels = jnp.where(y_ref[...] == -1, 1, y_ref[...])              # (1, tile_n)
    cls = lax.broadcasted_iota(jnp.int32, out_ref.shape, 0)          # (C, tile_n)
    out_ref[...] = (cls == labels).astype(jnp.float32)


# ----------------------------- wrappers ------------------------------------ #

def _round_down(x, m):
    return (x // m) * m


def _pick_tile_h(H, W):
    """Multiple-of-8 row tile with tile_h*W <= budget; prefer >= 2 grid steps."""
    tile_h = max(8, _round_down(_MAX_TILE_ELEMS // max(W, 1), 8))
    tile_h = min(tile_h, H)
    if tile_h >= H and H > 8:  # split so the parallel axis has >= 2 steps
        tile_h = max(8, _round_down(pl.cdiv(H, 2), 8))
    return max(1, min(tile_h, H))


def _prediction_direct(target_image):
    """W >= 128: write (1, C, H, W) directly, W stays the lane dim."""
    H, W = target_image.shape
    tile_h = _pick_tile_h(H, W)
    grid = (pl.cdiv(H, tile_h),)
    return pl.pallas_call(
        _one_hot_hw_kernel,
        out_shape=jax.ShapeDtypeStruct((1, NUM_CLASSES, H, W), jnp.float32),
        grid_spec=pl.GridSpec(
            grid=grid,
            in_specs=[pl.BlockSpec((tile_h, W), lambda i: (i, 0))],
            out_specs=pl.BlockSpec((None, NUM_CLASSES, tile_h, W),
                                   lambda i: (0, 0, i, 0)),
        ),
        compiler_params=pltpu.CompilerParams(
            dimension_semantics=("parallel",),
            vmem_limit_bytes=_VMEM_LIMIT_BYTES,
        ),
        cost_estimate=pl.CostEstimate(
            flops=2 * NUM_CLASSES * H * W,
            transcendentals=0,
            bytes_accessed=4 * H * W + 4 * NUM_CLASSES * H * W,
        ),
    )(target_image.astype(jnp.int32))


def _prediction_flat(target_image):
    """W < 128: flatten spatial dims to a lane-dense, padded (1, N) row."""
    H, W = target_image.shape
    N = H * W
    tile_n = 128 * max(1, min(_MAX_TILE_ELEMS // 128, pl.cdiv(N, 2 * 128)))
    n_pad = tile_n * pl.cdiv(N, tile_n)

    labels = target_image.reshape(-1).astype(jnp.int32)
    if n_pad != N:
        labels = jnp.pad(labels, (0, n_pad - N))
    labels = labels.reshape(1, n_pad)

    pred_flat = pl.pallas_call(
        _one_hot_flat_kernel,
        out_shape=jax.ShapeDtypeStruct((NUM_CLASSES, n_pad), jnp.float32),
        grid_spec=pl.GridSpec(
            grid=(n_pad // tile_n,),
            in_specs=[pl.BlockSpec((1, tile_n), lambda i: (0, i))],
            out_specs=pl.BlockSpec((NUM_CLASSES, tile_n), lambda i: (0, i)),
        ),
        compiler_params=pltpu.CompilerParams(
            dimension_semantics=("parallel",),
            vmem_limit_bytes=_VMEM_LIMIT_BYTES,
        ),
        cost_estimate=pl.CostEstimate(
            flops=2 * NUM_CLASSES * n_pad,
            transcendentals=0,
            bytes_accessed=4 * n_pad + 4 * NUM_CLASSES * n_pad,
        ),
    )(labels)
    # Small-W fallback only; the slice/reshape here touches little data.
    return pred_flat[:, :N].reshape(NUM_CLASSES, H, W)[None, ...]


def dummy_segmentation_prediction(target_image):
    """Builds the one-hot prediction (1, NUM_CLASSES, H, W) float32."""
    _, W = target_image.shape
    if W >= 128:
        return _prediction_direct(target_image)
    return _prediction_flat(target_image)


class DummySegmentationModel:
    """Mirrors the PyTorch module: prediction computed once, forward ignores x."""

    def __init__(self, target_image):
        # TODO(synk): the PyTorch module mutates target_image in place; here the
        # -1 -> 1 remap is done functionally inside the kernel instead.
        self.prediction = jax.block_until_ready(
            dummy_segmentation_prediction(target_image))

    def forward(self, x):
        return self.prediction

    __call__ = forward


def reference_forward(target_image):
    """Pure-JAX reference matching the PyTorch semantics."""
    labels = jnp.where(target_image == -1, 1, target_image)
    oh = jax.nn.one_hot(labels, NUM_CLASSES, dtype=jnp.float32)  # (H, W, C)
    return jnp.transpose(oh, (2, 0, 1))[None, ...]               # (1, C, H, W)


if __name__ == "__main__":
    key = jax.random.PRNGKey(0)
    k1, k2, k3 = jax.random.split(key, 3)

    # --- flattened path (W < 128) through the module-like wrapper ---
    H1, W1 = 16, 16
    tgt_small = jax.random.randint(k1, (H1, W1), minval=-1,
                                   maxval=NUM_CLASSES, dtype=jnp.int32)
    model = DummySegmentationModel(tgt_small)
    # x is ignored by forward (matches the PyTorch module), built for signature parity.
    x = jax.random.normal(k2, (2, 3, H1, W1), dtype=jnp.float32)
    pred = jax.block_until_ready(model.forward(x))
    ref = reference_forward(tgt_small)
    assert pred.shape == (1, NUM_CLASSES, H1, W1), pred.shape
    assert pred.dtype == jnp.float32
    assert jnp.array_equal(pred, ref), "flattened-path one-hot mismatch"

    # --- direct lane-dense path (W >= 128) ---
    H2, W2 = 16, 128
    tgt_wide = jax.random.randint(k3, (H2, W2), minval=-1,
                                  maxval=NUM_CLASSES, dtype=jnp.int32)
    pred_wide = jax.block_until_ready(dummy_segmentation_prediction(tgt_wide))
    ref_wide = reference_forward(tgt_wide)
    assert pred_wide.shape == (1, NUM_CLASSES, H2, W2), pred_wide.shape
    assert pred_wide.dtype == jnp.float32
    assert jnp.array_equal(pred_wide, ref_wide), "direct-path one-hot mismatch"

    print("KERNEL_OK")
</pallas_src>

<mosaic_0001>
module attributes {stable_mosaic.version = 11 : i64} {
  func.func @_one_hot_flat_kernel(%arg0: i32, %arg1: memref<1x128xi32, #tpu.memory_space<vmem>>, %arg2: memref<23x128xf32, #tpu.memory_space<vmem>>) attributes {dimension_semantics = [#tpu.dimension_semantics<parallel>], iteration_bounds = array<i64: 2>, scalar_prefetch = 0 : i64, scratch_operands = 0 : i64, tpu.core_type = #tpu.core_type<tc>, window_params = [{transform_indices = @transform_0, window_bounds = array<i64: 1, 128>}, {transform_indices = @transform_1, window_bounds = array<i64: 23, 128>}]} {
    %c0 = arith.constant 0 : index
    %c0_0 = arith.constant 0 : index
    %0 = vector.load %arg1[%c0, %c0_0] : memref<1x128xi32, #tpu.memory_space<vmem>>, vector<1x128xi32>
    %c-1_i32 = arith.constant -1 : i32
    %1 = vector.broadcast %c-1_i32 : i32 to vector<1x128xi32>
    %2 = arith.cmpi eq, %0, %1 : vector<1x128xi32>
    %c0_1 = arith.constant 0 : index
    %c0_2 = arith.constant 0 : index
    %3 = vector.load %arg1[%c0_1, %c0_2] : memref<1x128xi32, #tpu.memory_space<vmem>>, vector<1x128xi32>
    %c1_i32 = arith.constant 1 : i32
    %4 = vector.broadcast %c1_i32 : i32 to vector<1x128xi32>
    %5 = arith.select %2, %4, %3 : vector<1x128xi1>, vector<1x128xi32>
    %6 = tpu.iota {dimensions = array<i32: 0>} : vector<23x128xi32>
    %7 = vector.broadcast %5 : vector<1x128xi32> to vector<23x128xi32>
    %8 = arith.cmpi eq, %6, %7 : vector<23x128xi32>
    %9 = arith.extui %8 : vector<23x128xi1> to vector<23x128xi32>
    %10 = arith.sitofp %9 : vector<23x128xi32> to vector<23x128xf32>
    %c0_3 = arith.constant 0 : index
    %c0_4 = arith.constant 0 : index
    %11 = vector.load %arg2[%c0_3, %c0_4] : memref<23x128xf32, #tpu.memory_space<vmem>>, vector<23x128xf32>
    tpu.vector_store %arg2[%c0_3, %c0_4], %10 {strides = array<i32>} : memref<23x128xf32, #tpu.memory_space<vmem>>, vector<23x128xf32>,
    return
  }
  func.func @transform_0(%arg0: i32) -> (i32, i32) {
    %c0_i32 = arith.constant 0 : i32
    %c0_i32_0 = arith.constant 0 : i32
    return %c0_i32, %arg0 : i32, i32
  }
  func.func @transform_1(%arg0: i32) -> (i32, i32) {
    %c0_i32 = arith.constant 0 : i32
    %c0_i32_0 = arith.constant 0 : i32
    return %c0_i32, %arg0 : i32, i32
  }
}

</mosaic_0001>

<bundles_post_ra>
// kernel: tpu_custom_call.1
= control target key start
LH: loop header
LB: loop body
LE: loop exit
PB: predicated region body
PF: predicated region fallthrough
CT: control target
= control target key end

     0   :  { %6 = vsyncpa [#allocation3], 0  ;;  %s535_s0 = inlined_call_operand.hbm [shape: s32[1,256], index: 0, kind: input, shape index: {}]   ;;  %s536_s1 = inlined_call_operand.hbm [shape: f32[23,256], index: 1, kind: output, shape index: {}]  }
   0x1   :  { %8 = vsyncpa [#allocation3 + $0x1], 0 }
   0x2   :  { %9 = vsyncpa [#allocation4], 0 }
   0x3   :  { %11 = vsyncpa [#allocation4 + $0x1], 0  ;;  %s407_s6 = smov 0   ;;  %s409_s7 = smov 0  }
   0x4   :  { %s411_s8 = smov 0   ;;  %s413_s9 = smov 0  }
   0x5 LB: > { %s428_s10 = sadd.s32 4294967295, %s391_s9   ;;  %s234_s11 = sadd.s32 4294967294, %s391_s9   ;;  %s391_s9 = sphi %s413_s9, %s546_s9   ;;  %s387_s8 = sphi %s411_s8, %s545_s8   ;;  %s383_s7 = sphi %s409_s7, %s544_s7   ;;  %s379_s6 = sphi %s407_s6, %s543_s6  }
   0x6   : > { %s432_s12 = sadd.s32 1, %s391_s9   ;;  %s24_s13 = sadd.s32 1, %s387_s8 }
   0x7   : > { %s21_s14 = ssub.s32 %s391_s9, %s432_s12  ;;  %p31_p0 = scmp.ne.s32.totalorder %s387_s8, %s383_s7 }
   0x8   : > { %p22_p1 = scmp.eq.s32.totalorder %s21_s14, 0  ;;  %p32_p2 = scmp.eq.s32.totalorder %s391_s9, 0 }
   0x9   : > { %p37_p3 = scmp.ne.s32.totalorder %s383_s7, %s379_s6  ;;  %p38_p4 = scmp.eq.s32.totalorder %s428_s10, 0 }
   0xa   : > { %s444_s15 = scalar_select %p22_p1, %s387_s8, %s24_s13  }
   0xb   : > { %p446_p5 = por %p32_p2, %p31_p0  ;;  %p450_p6 = por %p38_p4, %p37_p3 }
   0xc   : > { %p61_p7 = scmp.eq.s32.totalorder %s428_s10, 1  ;;  %p67_p8 = scmp.eq.s32.totalorder %s234_s11, 1 }
   0xd   : > { %p257_p10 = scmp.lt.s32.totalorder %s391_s9, 2  ;;  %s87_s20 = sand.u32 1, %s387_s8  }
   0xe   : > { %p457_p11 = por %p61_p7, %p31_p0  ;;  %p461_p12 = por %p67_p8, %p37_p3 }
   0xf   : > { %s93_s23 = scalar_lea.hbm %s535_s0, %s391_s9  ;;  %s90_s25 = scalar_lea.vmem [#allocation2], %s87_s20 }
  0x10   : > { %s95_s24 = sshll.u32 %s93_s23, 4  ;;  %s97_s26 = sshll.u32 %s90_s25, 4  ;;  %s96_s24 = int_to_ptr.hbm [resolvable:$true] %s95_s24  ;;  %s98_s26 = int_to_ptr.vmem [resolvable:$true] %s97_s26 }
  0x11   : > { %p472_p13 = pnand %p257_p10, %p446_p5  ;;  %p237_p0 = scmp.ge.s32.totalorder %s391_s9, 1 }
  0x12   : > { %p102_p1 = scmp.lt.s32.totalorder %s391_s9, 3  ;;  %s88_s28 = scalar_lea.sflag [#allocation3], %s87_s20 }
  0x13   : > { %s295_s29 = sshra.s32 %s96_s24, 4  ;;  %p299_p3 = pneg %p472_p13  ;;  %s296_s29 = int_to_ptr.hbm [resolvable:$true] %s295_s29 }
  0x14   : > { %s297_s30 = scalar_lea.hbm %s296_s29, 1  ;;  %s302_s4 = scalar_lea.hbm %s535_s0, 2 }
  0x15   : > { %p298_p2 = scmp.ne.s32.totalorder %s296_s29, %s297_s30  ;;  %p303_p5 = scmp.lt.s32.totalorder %s296_s29, %s535_s0 }
  0x16   : > { %p304_p8 = scmp.lt.s32.totalorder %s302_s4, %s297_s30 }
  0x17   : > { %p300_p4 = pnand %p299_p3, %p298_p2 }
  0x18   : > { %p305_p10 = por %p304_p8, %p303_p5 }
  0x19   : > { %p301_p7 = pneg %p300_p4 }
  0x1b   : > { %p306_p9 = pnand %p305_p10, %p301_p7 }
  0x1d   : > { %309 = shalt.err (!%p306_p9)
}
  0x1e   : > { %252 = dma.hbm_to_vmem [thread:$0]  (!%p472_p13), %s96_s24, 16, %s98_s26, %s88_s28  }
  0x1f   : > { %p103_p2 = pnand %p237_p0, %p102_p1 }
  0x20   : > { %s493_s13 = sand.u32 (!%p103_p2), 1, %s383_s7  }
  0x21   : > { %106 = sbr.rel (%p103_p2) target bundleno = 56 (0x38), region = 24  ;;  %s109_s14 = scalar_lea.sflag (!%p103_p2), [#allocation3], %s493_s13 }
  0x22   : > { %s111_s16 = scalar_lea.vmem (!%p103_p2), [#allocation2], %s493_s13 }
  0x26   : > { %370 = dma.done.wait (%p450_p6), %s109_s14, 16  }
  0x27   : > { %372 = vsyncadd (%p450_p6), %s109_s14, 4294967280  ;;  %v133_v0 = vlaneseq  ;;  %s244_s20 = smul.u32 24, %s493_s13  ;;  %s241_s21 = sshll.u32 %s428_s10, 3  ;;  %v130_v2 = vld [vmem:[%s111_s16] sm:$0x1]  ;;  %v393_v7 = vmov 0.0  }
  0x28   : > { %s161_s24 = scalar_lea.hbm %s536_s1, %s241_s21  ;;  %vm131_vm0 = vcmp.eq.s32.totalorder %v130_v2, 4294967295  ;;  %s151_s10 = scalar_lea.sflag [#allocation4], %s493_s13 }
  0x29   : > { %v134_v1 = vshrl.u32 %v133_v0, 7  ;;  %v132_v5 = vsel %vm131_vm0, 1, %v130_v2  ;;  %s129_s25 = scalar_lea.vmem [#allocation5], %s244_s20  ;;  %s164_s26 = sshll.u32 %s161_s24, 4  ;;  %s165_s26 = int_to_ptr.hbm [resolvable:$true] %s164_s26 }
  0x2a   : > { %v137_v6 = vperm.slane %v132_v5, 0  ;;  %s162_s17 = sshll.u32 %s129_s25, 4  ;;  %s339_s27 = sshra.s32 %s165_s26, 4  ;;  %s163_s17 = int_to_ptr.vmem [resolvable:$true] %s162_s17  ;;  %s340_s27 = int_to_ptr.hbm [resolvable:$true] %s339_s27 }
  0x2b   : > { %v135_v3 = vadd.s32 8, %v134_v1  ;;  %v136_v4 = vadd.s32 16, %v134_v1  ;;  %s341_s28 = scalar_lea.hbm %s340_s27, 24  ;;  %s345_s2 = scalar_lea.hbm %s536_s1, 48 }
  0x2c   : > { %vm138_vm1 = vcmp.eq.s32.totalorder %v134_v1, %v137_v6  ;;  %p342_p6 = scmp.ne.s32.totalorder %s340_s27, %s341_s28  ;;  %p346_p0 = scmp.lt.s32.totalorder %s340_s27, %s536_s1 }
  0x2d   : > { %vm139_vm2 = vcmp.eq.s32.totalorder %v135_v3, %v137_v6  ;;  %vm140_vm3 = vcmp.eq.s32.totalorder %v136_v4, %v137_v6  ;;  %v238_v8 = vsel %vm138_vm1, 1.0, %v393_v7  ;;  %p347_p1 = scmp.lt.s32.totalorder %s345_s2, %s341_s28 }
  0x2e   : > { %v239_v9 = vsel %vm139_vm2, 1.0, %v393_v7  ;;  %v240_v10 = vsel %vm140_vm3, 1.0, %v393_v7  ;;  %147 = vst [vmem:[%s129_s25] sm:$0xff] %v238_v8  ;;  %p343_p9 = pnand %p342_p6, %p457_p11 }
  0x2f   : > { %148 = vst [vmem:[%s129_s25 + $0x8] sm:$0xff] %v239_v9  ;;  %p348_p3 = por %p347_p1, %p346_p0 }
  0x30   : > { %149 = vst [vmem:[%s129_s25 + $0x10] sm:$0x7f] %v240_v10  ;;  %p344_p13 = pneg %p343_p9 }
  0x32   : > { %p349_p4 = pnand %p348_p3, %p344_p13 }
  0x34   : > { %352 = shalt.err (!%p349_p4)
}
  0x35   : > { %s394_s5 = smov 128   ;;  %s395_s11 = smov 256  }
  0x36   : > { %s396_s13 = smov 8  }
  0x37   : > { %247 = dma.vmem_to_hbm [thread:$0]  (%p457_p11), %s163_s17, 384, %s165_s26, %s151_s10, %s394_s5, %s395_s11, %s396_s13  }
  0x38 PF: > { %s179_s14 = sand.u32 1, %s379_s6   ;;  %p542_p7 = scmp.ge.s32.totalorder %s391_s9, 2 }
  0x39   : > { %s180_s16 = scalar_lea.sflag [#allocation4], %s179_s14 }
  0x3a   : > { %p254_p5 = pnand %p542_p7, %p461_p12 }
  0x3c   : > { %p255_p8 = pneg %p254_p5 }
  0x3e   : > { %374 = dma.done.wait (%p255_p8), %s180_s16, 384  }
  0x3f   : > { %376 = vsyncadd (%p255_p8), %s180_s16, 4294966912  ;;  %p14_p10 = scmp.ge.s32.totalorder %s432_s12, 4   ;;  %s543_s6 = smov %s383_s7 }
  0x40   : > { %s544_s7 = smov %s387_s8  ;;  %s545_s8 = smov %s444_s15 }
  0x41   : > { %s546_s9 = smov %s432_s12  ;;  %16 = sbr.rel (!%p14_p10) target bundleno = 5 (0x5), region = 69 }
  0x46   :  { %186 = vsyncpa [#allocation3], 1 }
  0x47   :  { %188 = vsyncpa [#allocation3 + $0x1], 1 }
  0x48   :  { %189 = vsyncpa [#allocation4], 1 }
  0x49   :  { %191 = vsyncpa [#allocation4 + $0x1], 1 }

</bundles_post_ra>
